<compile_context>
chip_gen: v7x
topology: tpu7x:2x2x1
jax: 0.10.0
libtpu: 0.0.40
codegen_flags: <defaults>
</compile_context>

<pallas_src>
import functools

import jax
import jax.numpy as jnp
from jax import lax
from jax.experimental import pallas as pl
from jax.experimental.pallas import tpu as pltpu


def _conv_gemm_kernel(x_ref, w_ref, b_ref, o_ref):
  """One fused GEMM for the whole batch: conv-as-matmul + bias + ReLU.

  x_ref: (B*H, Kpad)     bf16  im2col'ed padded input rows (all taps merged)
  w_ref: (Kpad, W*Cout)  bf16  banded conv weights (K zero-padded)
  b_ref: (1, W*Cout)     f32   bias tiled over W (lane-dense)
  o_ref: (B*H, W*Cout)   f32   lane-dense output rows
  """
  acc = jnp.dot(x_ref[...], w_ref[...], preferred_element_type=jnp.float32)
  acc = acc + b_ref[...]                    # (1, W*Cout) broadcasts over rows
  o_ref[...] = jnp.maximum(acc, 0.0).astype(o_ref.dtype)


def prepare_pruned_conv_params(weight, bias, w):
  """Precompute the merged-K banded weight + lane-dense bias row.

  Runs ONCE per weight update (outside the per-call forward path); depends
  only on the conv weights and the spatial width W.

  big_w[t*Kl + (wo+dx)*Cin + ci, wo*Cout + co] = weight[co, ci, t, dx]
  with Kl = (W + 2*pw) * Cin, so that
  out[h, wo*Cout + co] = sum_t x_pad[h+t, :] @ big_w_band[t] + bias.
  """
  cout, cin, kh, kw = weight.shape
  pw = kw // 2
  wp = w + 2 * pw
  k_lanes = wp * cin                        # lanes per padded input row
  n_lanes = w * cout                        # lane-dense output width (=128)
  k_total = kh * k_lanes                    # merged contraction dim (=216)
  k_pad = ((k_total + 127) // 128) * 128    # pad K to a multiple of 128 (=256)

  w_hwio = jnp.transpose(weight, (2, 3, 1, 0))              # (KH, KW, Cin, Cout)
  shift = (jnp.arange(wp)[None, :, None]
           == jnp.arange(w)[None, None, :] + jnp.arange(kw)[:, None, None]
           ).astype(weight.dtype)                           # (KW, Wp, W)
  big_w = jnp.einsum('xpw,hxio->hpiwo', shift, w_hwio)      # (KH, Wp, Cin, W, Cout)
  big_w = big_w.reshape(k_total, n_lanes)
  big_w = jnp.pad(big_w, ((0, k_pad - k_total), (0, 0)))
  big_w = big_w.astype(jnp.bfloat16)                        # bf16 MXU operand

  b_row = jnp.tile(bias, w).reshape(1, n_lanes).astype(jnp.float32)
  return big_w, b_row


@functools.partial(jax.jit, static_argnames=("kh", "kw"))
def pruning_module_forward(x_nchw, big_w, b_row, *, kh=3, kw=3):
  """Forward of PruningModule wrapping Conv2d(Cin,Cout,3,pad=1) + ReLU.

  x_nchw: (B, Cin, H, W) float32        (PyTorch NCHW activation layout)
  big_w:  (Kpad, W*Cout) bfloat16       precomputed banded weight
  b_row:  (1, W*Cout) float32           precomputed lane-dense bias row
  returns: (B, Cout, H, W) float32
  """
  b, cin, h, w = x_nchw.shape
  k_pad, n_lanes = big_w.shape
  cout = n_lanes // w
  ph, pw = kh // 2, kw // 2
  k_lanes = (w + 2 * pw) * cin
  k_total = kh * k_lanes

  # --- prologue glue (eligible for input fusion into the pallas operand) ----
  x_nhwc = jnp.transpose(x_nchw, (0, 2, 3, 1))
  x_pad = jnp.pad(x_nhwc, ((0, 0), (ph, ph), (pw, pw), (0, 0)))
  x_rows = x_pad.reshape(b, h + 2 * ph, k_lanes)            # (B, H+2ph, Kl)
  # im2col of the KH row taps, merged onto the lane (K) axis.
  x_slab = jnp.concatenate([x_rows[:, t:t + h, :] for t in range(kh)], axis=-1)
  x_slab = x_slab.reshape(b * h, k_total)
  x_slab = jnp.pad(x_slab, ((0, 0), (0, k_pad - k_total)))
  x_slab = x_slab.astype(big_w.dtype)                       # bf16 MXU operand

  cost = pl.CostEstimate(
      flops=2 * b * h * w * kh * kw * cin * cout,
      transcendentals=0,
      bytes_accessed=2 * (x_slab.size + big_w.size)
                     + 4 * (b_row.size + b * h * n_lanes))

  # --- single-step Pallas GEMM: whole problem in one block (VMEM resident) --
  out_rows = pl.pallas_call(
      _conv_gemm_kernel,
      out_shape=jax.ShapeDtypeStruct((b * h, n_lanes), jnp.float32),
      in_specs=[
          pl.BlockSpec(memory_space=pltpu.MemorySpace.VMEM),
          pl.BlockSpec(memory_space=pltpu.MemorySpace.VMEM),
          pl.BlockSpec(memory_space=pltpu.MemorySpace.VMEM),
      ],
      out_specs=pl.BlockSpec(memory_space=pltpu.MemorySpace.VMEM),
      compiler_params=pltpu.CompilerParams(
          allow_input_fusion=[True, False, False]),
      cost_estimate=cost,
  )(x_slab, big_w, b_row)

  # --- epilogue glue: back to NCHW (module boundary is PyTorch Conv2d) -------
  out_nhwc = out_rows.reshape(b, h, w, cout)
  return jnp.transpose(out_nhwc, (0, 3, 1, 2))


def _reference_forward(x_nchw, weight, bias):
  """Pure-JAX reference (lax conv, f32) for correctness checking."""
  out = lax.conv_general_dilated(
      x_nchw, weight,
      window_strides=(1, 1), padding="SAME",
      dimension_numbers=("NCHW", "OIHW", "NCHW"))
  out = out + bias.reshape(1, -1, 1, 1)
  return jnp.maximum(out, 0.0)


if __name__ == "__main__":
  # Deterministic params & input (synthetic; no checkpoint load).
  key = jax.random.PRNGKey(0)
  k_x, k_w, k_b = jax.random.split(key, 3)

  B, CIN, H, W = 2, 4, 16, 16
  COUT, KH, KW = 8, 3, 3

  x = jax.random.normal(k_x, (B, CIN, H, W), dtype=jnp.float32)
  weight = jax.random.normal(k_w, (COUT, CIN, KH, KW), dtype=jnp.float32) * 0.1
  bias = jax.random.normal(k_b, (COUT,), dtype=jnp.float32) * 0.1

  # Weight-dependent precompute: once per weight update, not per forward call.
  big_w, b_row = prepare_pruned_conv_params(weight, bias, W)

  out = jax.block_until_ready(
      pruning_module_forward(x, big_w, b_row, kh=KH, kw=KW))

  ref = _reference_forward(x, weight, bias)
  assert out.shape == (B, COUT, H, W)
  # bf16 MXU operands (f32 accumulation): relaxed tolerance vs f32 reference.
  assert jnp.allclose(out, ref, atol=5e-2, rtol=5e-2), "mismatch vs reference"

  # TODO(synk): save()/state_dict()/padded_state_dict() (graph-dependent sparse
  # re-padding + checkpoint I/O) have no Pallas equivalent; forward only.
  print("KERNEL_OK")
</pallas_src>

<mosaic_0001>
module attributes {stable_mosaic.version = 11 : i64} {
  func.func @_conv_gemm_kernel(%arg0: memref<32x256xbf16, #tpu.memory_space<vmem>>, %arg1: memref<256x128xbf16, #tpu.memory_space<vmem>>, %arg2: memref<1x128xf32, #tpu.memory_space<vmem>>, %arg3: memref<32x128xf32, #tpu.memory_space<vmem>>) attributes {dimension_semantics = [], scalar_prefetch = 0 : i64, scratch_operands = 0 : i64, tpu.core_type = #tpu.core_type<tc>} {
    %c0 = arith.constant 0 : index
    %c0_0 = arith.constant 0 : index
    %0 = vector.load %arg0[%c0, %c0_0] : memref<32x256xbf16, #tpu.memory_space<vmem>>, vector<32x256xbf16>
    %c0_1 = arith.constant 0 : index
    %c0_2 = arith.constant 0 : index
    %1 = vector.load %arg1[%c0_1, %c0_2] : memref<256x128xbf16, #tpu.memory_space<vmem>>, vector<256x128xbf16>
    %cst = arith.constant dense<0.000000e+00> : vector<32x128xf32>
    %2 = tpu.matmul %0, %1, %cst {dimension_numbers = #tpu.dot_dimension_numbers<[1], [0], [0], [1], [0, 0, 1, 1], [], []>} : vector<32x256xbf16>, vector<256x128xbf16>, vector<32x128xf32> -> vector<32x128xf32>
    %c0_3 = arith.constant 0 : index
    %c0_4 = arith.constant 0 : index
    %3 = vector.load %arg2[%c0_3, %c0_4] : memref<1x128xf32, #tpu.memory_space<vmem>>, vector<1x128xf32>
    %4 = vector.broadcast %3 : vector<1x128xf32> to vector<32x128xf32>
    %5 = arith.addf %2, %4 : vector<32x128xf32>
    %cst_5 = arith.constant 0.000000e+00 : f32
    %6 = vector.broadcast %cst_5 : f32 to vector<32x128xf32>
    %7 = arith.maximumf %5, %6 : vector<32x128xf32>
    %c0_6 = arith.constant 0 : index
    %c0_7 = arith.constant 0 : index
    %8 = vector.load %arg3[%c0_6, %c0_7] : memref<32x128xf32, #tpu.memory_space<vmem>>, vector<32x128xf32>
    tpu.vector_store %arg3[%c0_6, %c0_7], %7 {strides = array<i32>} : memref<32x128xf32, #tpu.memory_space<vmem>>, vector<32x128xf32>,
    return
  }
}

</mosaic_0001>

<bundles_post_ra>
// kernel: pruning_module_forward.2
= control target key start
LH: loop header
LB: loop body
LE: loop exit
PB: predicated region body
PF: predicated region fallthrough
CT: control target
= control target key end

     0   :  { %s588_s0 = inlined_call_operand.vmem [shape: bf16[256,128], index: 0, kind: input, shape index: {}]   ;;  %s589_s1 = inlined_call_operand.vmem [shape: f32[1,128], index: 1, kind: input, shape index: {}]   ;;  %s590_s2 = inlined_call_operand.vmem [shape: bf16[32,216], index: 2, kind: input, shape index: {}]   ;;  %s591_s3 = inlined_call_operand.<no memory space> [shape: bf16[], index: 3, kind: input, shape index: {}]   ;;  %s592_s4 = inlined_call_operand.vmem [shape: f32[32,128], index: 4, kind: output, shape index: {}]  }
   0x1   :  { %v9_v0 = vstv %s591_s3 }
   0x2   :  { %v10_v1 = vunpack.i.l.bf16 %v9_v0 }
   0x3   :  { %v452_v2 = vld [vmem:[%s588_s0 + $0x40] sm:$0xff]   ;;  %v454_v4 = vld [vmem:[%s588_s0 + $0x48] sm:$0xff]   ;;  %v44_v6 = vlaneseq  ;;  %v456_v7 = vld [vmem:[%s588_s0 + $0x50] sm:$0xff]   ;;  %v474_v30 = vmov 0.0  }
   0x4   :  { %v453_v3 = vld [vmem:[%s588_s0] sm:$0xff]   ;;  %407 = vmatprep.subr.bf16.mxu0 %v452_v2  ;;  %435 = vmatprep.subr.bf16.mxu1 %v452_v2  ;;  %v455_v5 = vld [vmem:[%s588_s0 + $0x8] sm:$0xff]   ;;  %v457_v8 = vld [vmem:[%s588_s0 + $0x10] sm:$0xff]  }
   0x5   :  { %408 = vmatpush3.bf16.msra.mxu0 %v453_v3  ;;  %443 = vmatpush3.bf16.msra.mxu1 %v453_v3  ;;  %v45_v9 = vand.u32 127, %v44_v6  ;;  %v458_v10 = vld [vmem:[%s588_s0 + $0x58] sm:$0xff]   ;;  %v460_v13 = vld [vmem:[%s588_s0 + $0x60] sm:$0xff]   ;;  %v462_v15 = vld [vmem:[%s588_s0 + $0x68] sm:$0xff]  }
   0x6   :  { %409 = vmatprep.subr.bf16.mxu0 %v454_v4  ;;  %436 = vmatprep.subr.bf16.mxu1 %v454_v4  ;;  %v459_v11 = vld [vmem:[%s588_s0 + $0x18] sm:$0xff]   ;;  %v461_v14 = vld [vmem:[%s588_s0 + $0x20] sm:$0xff]   ;;  %v380_v18 = vld [vmem:[%s590_s2 + $0x8] sm:$0xf] }
   0x7   :  { %v46_v12 = vadd.s32 128, %v45_v9  ;;  %v20_v16 = vld [vmem:[%s590_s2] sm:$0xf]  ;;  %v379_v17 = vld [vmem:[%s590_s2 + $0x4] ss:$8 sps:$4 sm:$0xff]   ;;  %v464_v29 = vld [vmem:[%s588_s0 + $0x70] sm:$0xff]  }
   0x8   :  { %30 = vst [vmem:[#allocation7] sm:$0xf] %v20_v16  ;;  %v42_v19 = vunpack.c.l.bf16 %v379_v17  ;;  %65 = vst [vmem:[#allocation7 + $0x8] sm:$0xf] %v380_v18  ;;  %v77_v20 = vunpack.c.h.bf16 %v379_v17  ;;  %v382_v21 = vld [vmem:[%s590_s2 + $0x10] sm:$0xf] }
   0x9   :  { %410 = vmatpush3.bf16.msra.mxu0 %v455_v5  ;;  %444 = vmatpush3.bf16.msra.mxu1 %v455_v5  ;;  %vm47_vm0 = vcmp.lt.s32.totalorder %v46_v12, 216  ;;  %v383_v22 = vld [vmem:[%s590_s2 + $0x14] ss:$8 sps:$4 sm:$0xff]   ;;  %v384_v23 = vld [vmem:[%s590_s2 + $0x18] sm:$0xf]  ;;  %v463_v26 = vld [vmem:[%s588_s0 + $0x28] sm:$0xff]  }
   0xa   :  { %411 = vmatprep.subr.bf16.mxu0 %v456_v7  ;;  %437 = vmatprep.subr.bf16.mxu1 %v456_v7  ;;  %100 = vst [vmem:[#allocation7 + $0x10] sm:$0xf] %v382_v21  ;;  %v112_v24 = vunpack.c.l.bf16 %v383_v22  ;;  %135 = vst [vmem:[#allocation7 + $0x18] sm:$0xf] %v384_v23  ;;  %v147_v25 = vunpack.c.h.bf16 %v383_v22  ;;  %v48_v27 = vsel %vm47_vm0, %v42_v19, %v10_v1  ;;  %v465_v37 = vld [vmem:[%s588_s0 + $0x30] sm:$0xff]   ;;  %v466_v38 = vld [vmem:[%s588_s0 + $0x78] sm:$0xff]  }
   0xb   :  { %v83_v28 = vsel %vm47_vm0, %v77_v20, %v10_v1  ;;  %v50_v31 = vpack.c.bf16 %v474_v30, %v48_v27  ;;  %v467_v39 = vld [vmem:[%s588_s0 + $0x38] sm:$0xff]   ;;  %v386_v46 = vld [vmem:[%s589_s1] ss:$0 sm:$0xff] }
   0xc   :  { %v85_v32 = vpack.c.bf16 %v474_v30, %v83_v28  ;;  %v118_v33 = vsel %vm47_vm0, %v112_v24, %v10_v1  ;;  %v153_v35 = vsel %vm47_vm0, %v147_v25, %v10_v1 }
   0xd   :  { %412 = vmatpush3.bf16.msra.mxu0 %v457_v8  ;;  %445 = vmatpush3.bf16.msra.mxu1 %v457_v8  ;;  %v120_v34 = vpack.c.bf16 %v474_v30, %v118_v33  ;;  %52 = vst [vmem:[#allocation7 + $0x4] sm:$0xf] %v50_v31  ;;  %v155_v36 = vpack.c.bf16 %v474_v30, %v153_v35 }
   0xe   :  { %413 = vmatprep.subr.bf16.mxu0 %v458_v10  ;;  %438 = vmatprep.subr.bf16.mxu1 %v458_v10  ;;  %87 = vst [vmem:[#allocation7 + $0xc] sm:$0xf] %v85_v32 }
   0xf   :  { %122 = vst [vmem:[#allocation7 + $0x14] sm:$0xf] %v120_v34  ;;  %157 = vst [vmem:[#allocation7 + $0x1c] sm:$0xf] %v155_v36  ;;  %v468_v40 = vld [vmem:[#allocation7] ss:$8 sps:$4 sm:$0xff]  }
  0x11   :  { %414 = vmatpush3.bf16.msra.mxu0 %v459_v11  ;;  %446 = vmatpush3.bf16.msra.mxu1 %v459_v11  ;;  %v471_v42 = vld [vmem:[#allocation7 + $0x10] ss:$8 sps:$4 sm:$0xff]  }
  0x12   :  { %415 = vmatprep.subr.bf16.mxu0 %v460_v13  ;;  %439 = vmatprep.subr.bf16.mxu1 %v460_v13 }
  0x15   :  { %416 = vmatpush3.bf16.msra.mxu0 %v461_v14  ;;  %447 = vmatpush3.bf16.msra.mxu1 %v461_v14  ;;  %v470_v41 = vld [vmem:[#allocation7 + $0x4] ss:$8 sps:$4 sm:$0xff]  }
  0x16   :  { %417 = vmatprep.subr.bf16.mxu0 %v462_v15  ;;  %440 = vmatprep.subr.bf16.mxu1 %v462_v15  ;;  %v473_v43 = vld [vmem:[#allocation7 + $0x14] ss:$8 sps:$4 sm:$0xff]  }
  0x17   :  { %350 = vmatprep.mubr.bf16.mxu0 %v470_v41  ;;  %358 = vmatprep.mubr.bf16.mxu1 %v473_v43 }
  0x19   :  { %418 = vmatpush3.bf16.msra.mxu0 %v463_v26  ;;  %448 = vmatpush3.bf16.msra.mxu1 %v463_v26 }
  0x1a   :  { %419 = vmatprep.subr.bf16.mxu0 %v464_v29  ;;  %441 = vmatprep.subr.bf16.mxu1 %v464_v29 }
  0x1d   :  { %420 = vmatpush3.bf16.msra.mxu0 %v465_v37  ;;  %449 = vmatpush3.bf16.msra.mxu1 %v465_v37 }
  0x1e   :  { %421 = vmatprep.subr.bf16.mxu0 %v466_v38  ;;  %442 = vmatprep.subr.bf16.mxu1 %v466_v38 }
  0x21   :  { %422 = vmatpush3.bf16.msra.mxu0 %v467_v39  ;;  %450 = vmatpush3.bf16.msra.mxu1 %v467_v39 }
  0x24   :  { %351 = vmatmul.mubr.bf16.vlgmr.msra.gmra.mrb[0].mxu0 %v468_v40  ;;  %359 = vmatmul.mubr.bf16.vlgmr.msra.gmra.mrb[0].mxu1 %v471_v42 }
  0xf7   :  { %v423_v44 = vpop.f32.mrb[0].mxu0  ;;  %v429_v45 = vpop.f32.mrb[0].mxu1 }
  0xf8   :  { %v424_v47 = vpop.f32.mrb[1].mxu0  ;;  %v430_v48 = vpop.f32.mrb[1].mxu1 }
  0xf9   :  { %v425_v49 = vadd.f32 %v424_v47, %v423_v44  ;;  %v431_v50 = vadd.f32 %v430_v48, %v429_v45  ;;  %v426_v51 = vpop.f32.mrb[2].mxu0  ;;  %v432_v52 = vpop.f32.mrb[2].mxu1 }
  0xfa   :  { %v427_v53 = vpop.f32.mrb[3].mxu0  ;;  %v433_v54 = vpop.f32.mrb[3].mxu1 }
  0xfb   :  { %v353_v55 = vadd.f32 %v425_v49, %v386_v46  ;;  %v361_v56 = vadd.f32 %v431_v50, %v386_v46  ;;  %v428_v57 = vadd.f32 %v427_v53, %v426_v51  ;;  %v434_v58 = vadd.f32 %v433_v54, %v432_v52 }
  0xfd   :  { %v367_v59 = vmax.f32 %v353_v55, 0.0  ;;  %v369_v60 = vmax.f32 %v361_v56, 0.0  ;;  %v356_v61 = vadd.f32 %v428_v57, %v386_v46  ;;  %v364_v62 = vadd.f32 %v434_v58, %v386_v46 }
  0xff   :  { %371 = vst [vmem:[%s592_s4] sm:$0xff] %v367_v59  ;;  %373 = vst [vmem:[%s592_s4 + $0x10] sm:$0xff] %v369_v60  ;;  %v368_v63 = vmax.f32 %v356_v61, 0.0  ;;  %v370_v0 = vmax.f32 %v364_v62, 0.0 }
 0x101   :  { %372 = vst [vmem:[%s592_s4 + $0x8] sm:$0xff] %v368_v63  ;;  %374 = vst [vmem:[%s592_s4 + $0x18] sm:$0xff] %v370_v0 }

</bundles_post_ra>
